<compile_context>
chip_gen: v5e
topology: v5e:2x2
jax: 0.10.0
libtpu: 0.0.40
codegen_flags: <defaults>
</compile_context>

<pallas_src>
import functools

import jax
import jax.numpy as jnp
from jax.experimental import pallas as pl
from jax.experimental.pallas import tpu as pltpu


def _cdiv(a, b):
    return (a + b - 1) // b


def _round_up(a, b):
    return _cdiv(a, b) * b


def actor_mlp_kernel(x_ref, w1_ref, b1_ref, w2_ref, b2_ref, w3_ref, b3_ref,
                     o_ref):
    """Fused 3-layer MLP for one batch tile: (Linear+ReLU) x2 -> Linear -> Sigmoid."""
    w_dtype = w1_ref.dtype                     # bf16 (default) or f32
    # In-kernel cast of the streamed activation tile: single-pass MXU operands
    # with zero extra HBM traffic (no wrapper-side cast round-trip).
    x = x_ref[...].astype(w_dtype)

    h1 = jnp.dot(x, w1_ref[...], preferred_element_type=jnp.float32)
    h1 = jnp.maximum(h1 + b1_ref[...], 0.0)                      # f32 epilogue (VPU)

    h2 = jnp.dot(h1.astype(w_dtype), w2_ref[...],
                 preferred_element_type=jnp.float32)
    h2 = jnp.maximum(h2 + b2_ref[...], 0.0)

    logits = jnp.dot(h2.astype(w_dtype), w3_ref[...],
                     preferred_element_type=jnp.float32)
    logits = logits + b3_ref[...]

    # logistic lowers to the EUP (its own issue slot) -> keeps the VPU free.
    o_ref[...] = jax.nn.sigmoid(logits).astype(o_ref.dtype)


def _pick_batch_tile(batch, max_tile=2048):
    """Choose the batch tile.

    - B <= max_tile: one grid step (8-aligned) -> per-step overhead paid once.
    - B >  max_tile: balanced 256-aligned tiles with an EVEN number of steps,
      so on v7x (2 TCs/chip, core_parallel) both cores get identical work; 256
      also matches the v6e/v7x MXU LHS pass and is a multiple of v5e's 128.
    VMEM stays tiny either way (<~3 MiB including double buffers).
    """
    if batch <= max_tile:
        return max(8, _round_up(batch, 8))
    n_steps = _cdiv(batch, max_tile)
    if n_steps % 2:
        n_steps += 1
    return max(256, _round_up(_cdiv(batch, n_steps), 256))


@functools.partial(jax.jit,
                   static_argnames=("batch_tile", "use_bf16", "core_parallel"))
def actor_ppo_forward(state, params, batch_tile=None, use_bf16=True,
                      core_parallel=False):
    """ActorPPO forward pass.

    state:  [B, state_dim] float32
    params: dict with w1 [S,64], b1 [1,64], w2 [64,64], b2 [1,64],
            w3 [64,A], b3 [1,A]  (all float32)
    returns [B, action_dim] float32 in (0, 1)

    use_bf16:       cast WEIGHTS to bf16 here (tiny) and the activation tile
                    in-kernel; f32 accumulation + f32 epilogue.
    core_parallel:  set True on v7x to shard the batch axis across the two
                    TensorCores (pltpu.CORE_PARALLEL).
    """
    w1, b1 = params["w1"], params["b1"]
    w2, b2 = params["w2"], params["b2"]
    w3, b3 = params["w3"], params["b3"]

    B, S = state.shape
    H = w1.shape[1]
    A = w3.shape[1]

    if use_bf16:
        # Weights only (~14 KB): the streamed batch is cast inside the kernel.
        w1 = w1.astype(jnp.bfloat16)
        w2 = w2.astype(jnp.bfloat16)
        w3 = w3.astype(jnp.bfloat16)

    if batch_tile is None:
        batch_tile = _pick_batch_tile(B)
    batch_tile = max(8, _round_up(int(batch_tile), 8))

    # No jnp.pad / output slice: Pallas masks the edge block (rows are
    # independent, so garbage lanes of the last block never reach valid rows).
    grid = (_cdiv(B, batch_tile),)

    weight_bytes = sum(int(a.size) * int(a.dtype.itemsize)
                       for a in (w1, b1, w2, b2, w3, b3))
    cost = pl.CostEstimate(
        flops=int(2 * B * (S * H + H * H + H * A)),
        transcendentals=int(B * A),
        bytes_accessed=int(B * (S * int(state.dtype.itemsize) + A * 4)
                           + weight_bytes),
    )

    dim_sem = (pltpu.CORE_PARALLEL,) if core_parallel else ("parallel",)

    out = pl.pallas_call(
        actor_mlp_kernel,
        out_shape=jax.ShapeDtypeStruct((B, A), jnp.float32),
        grid_spec=pltpu.PrefetchScalarGridSpec(
            num_scalar_prefetch=0,
            grid=grid,
            in_specs=[
                # Activations: streamed over the batch in big tiles
                # (default double-buffering hides the per-step DMA).
                pl.BlockSpec((batch_tile, S), lambda i: (i, 0)),
                # Weights / biases: full blocks, constant index -> fetched once
                # and resident in VMEM across all grid steps (~14 KB total).
                pl.BlockSpec((S, H), lambda i: (0, 0)),
                pl.BlockSpec((1, H), lambda i: (0, 0)),
                pl.BlockSpec((H, H), lambda i: (0, 0)),
                pl.BlockSpec((1, H), lambda i: (0, 0)),
                pl.BlockSpec((H, A), lambda i: (0, 0)),
                pl.BlockSpec((1, A), lambda i: (0, 0)),
            ],
            # A equals the full minor dim (legal block); see header for why a
            # (bt, A) -> (bt/16, 16*A) lane-dense fold is still not done.
            out_specs=pl.BlockSpec((batch_tile, A), lambda i: (i, 0)),
        ),
        compiler_params=pltpu.CompilerParams(dimension_semantics=dim_sem),
        cost_estimate=cost,
    )(state, w1, b1, w2, b2, w3, b3)

    return out


def init_params(key, state_dim, action_dim, hidden=64):
    """torch.nn.Linear-style init: U(-1/sqrt(fan_in), 1/sqrt(fan_in)).

    Weights stored as [in, out] (transposed vs torch's [out, in]) so the kernel
    computes y = x @ W + b directly.
    """
    ks = jax.random.split(key, 6)

    def lin(kw, kb, fan_in, fan_out):
        bound = 1.0 / jnp.sqrt(fan_in)
        w = jax.random.uniform(kw, (fan_in, fan_out), jnp.float32,
                               minval=-bound, maxval=bound)
        b = jax.random.uniform(kb, (1, fan_out), jnp.float32,
                               minval=-bound, maxval=bound)
        return w, b

    w1, b1 = lin(ks[0], ks[1], state_dim, hidden)
    w2, b2 = lin(ks[2], ks[3], hidden, hidden)
    w3, b3 = lin(ks[4], ks[5], hidden, action_dim)
    return {"w1": w1, "b1": b1, "w2": w2, "b2": b2, "w3": w3, "b3": b3}


def reference_forward(state, params, use_bf16=False):
    """Pure-JAX reference mirroring the kernel math (optionally bf16 operands)."""
    cdt = jnp.bfloat16 if use_bf16 else jnp.float32

    def layer(x, w, b):
        return jnp.dot(x.astype(cdt), w.astype(cdt),
                       preferred_element_type=jnp.float32) + b

    h1 = jnp.maximum(layer(state, params["w1"], params["b1"]), 0.0)
    h2 = jnp.maximum(layer(h1, params["w2"], params["b2"]), 0.0)
    return jax.nn.sigmoid(layer(h2, params["w3"], params["b3"]))


# TODO(synk): act()'s epsilon-random action, the critic/MSELoss, the Adam
# update() step and save()/load() are training/IO utilities outside the
# forward pass and are not translated to Pallas.


if __name__ == "__main__":
    key = jax.random.PRNGKey(0)
    k_param, k_state = jax.random.split(key)

    state_dim = 32
    action_dim = 8

    params = init_params(k_param, state_dim, action_dim)

    # 1) Small batch, not a multiple of 8: single grid step + edge masking,
    #    default bf16 matmul operands.
    state_small = jax.random.normal(jax.random.fold_in(k_state, 0),
                                    (37, state_dim), jnp.float32)
    out_small = jax.block_until_ready(actor_ppo_forward(state_small, params))
    assert out_small.shape == (37, action_dim)
    # Exact-math check vs a bf16-mirroring reference...
    ref_bf16 = reference_forward(state_small, params, use_bf16=True)
    assert jnp.allclose(out_small, ref_bf16, atol=1e-5, rtol=1e-5), \
        "bf16-path mismatch vs bf16 reference"
    # ...and a sanity check vs the pure-f32 reference (bf16 rounding budget).
    ref_f32 = reference_forward(state_small, params, use_bf16=False)
    assert jnp.allclose(out_small, ref_f32, atol=5e-2), \
        "bf16-path too far from f32 reference"

    # 2) Same batch, full-precision path: tight tolerance vs f32 reference.
    out_f32 = jax.block_until_ready(
        actor_ppo_forward(state_small, params, use_bf16=False))
    assert jnp.allclose(out_f32, ref_f32, atol=1e-5, rtol=1e-5), \
        "f32-path mismatch vs reference"

    # 3) Larger batch with a forced small tile: multi-step grid (3 steps) plus
    #    a partially-valid edge block, f32 path, tight tolerance.
    state_big = jax.random.normal(jax.random.fold_in(k_state, 1),
                                  (300, state_dim), jnp.float32)
    out_big = jax.block_until_ready(
        actor_ppo_forward(state_big, params, batch_tile=128, use_bf16=False))
    assert out_big.shape == (300, action_dim)
    ref_big = reference_forward(state_big, params, use_bf16=False)
    assert jnp.allclose(out_big, ref_big, atol=1e-5, rtol=1e-5), \
        "multi-step-grid mismatch vs reference"

    # 4) Same larger batch with defaults (single step, bf16 operands).
    out_big_bf16 = jax.block_until_ready(actor_ppo_forward(state_big, params))
    ref_big_bf16 = reference_forward(state_big, params, use_bf16=True)
    assert jnp.allclose(out_big_bf16, ref_big_bf16, atol=1e-5, rtol=1e-5), \
        "default-path mismatch vs bf16 reference"

    print("KERNEL_OK")
</pallas_src>

<mosaic_0001>
module attributes {stable_mosaic.version = 11 : i64} {
  func.func @actor_mlp_kernel(%arg0: i32, %arg1: memref<40x32xf32, #tpu.memory_space<vmem>>, %arg2: memref<32x64xbf16, #tpu.memory_space<vmem>>, %arg3: memref<1x64xf32, #tpu.memory_space<vmem>>, %arg4: memref<64x64xbf16, #tpu.memory_space<vmem>>, %arg5: memref<1x64xf32, #tpu.memory_space<vmem>>, %arg6: memref<64x8xbf16, #tpu.memory_space<vmem>>, %arg7: memref<1x8xf32, #tpu.memory_space<vmem>>, %arg8: memref<40x8xf32, #tpu.memory_space<vmem>>) attributes {dimension_semantics = [#tpu.dimension_semantics<parallel>], iteration_bounds = array<i64: 1>, scalar_prefetch = 0 : i64, scratch_operands = 0 : i64, tpu.core_type = #tpu.core_type<tc>, window_params = [{transform_indices = @transform_0, window_bounds = array<i64: 40, 32>}, {pipeline_mode = #tpu.pipeline_mode<synchronous>, transform_indices = @transform_1, window_bounds = array<i64: 32, 64>}, {pipeline_mode = #tpu.pipeline_mode<synchronous>, transform_indices = @transform_2, window_bounds = array<i64: 1, 64>}, {pipeline_mode = #tpu.pipeline_mode<synchronous>, transform_indices = @transform_3, window_bounds = array<i64: 64, 64>}, {pipeline_mode = #tpu.pipeline_mode<synchronous>, transform_indices = @transform_4, window_bounds = array<i64: 1, 64>}, {pipeline_mode = #tpu.pipeline_mode<synchronous>, transform_indices = @transform_5, window_bounds = array<i64: 64, 8>}, {pipeline_mode = #tpu.pipeline_mode<synchronous>, transform_indices = @transform_6, window_bounds = array<i64: 1, 8>}, {transform_indices = @transform_7, window_bounds = array<i64: 40, 8>}]} {
    %c0 = arith.constant 0 : index
    %c0_0 = arith.constant 0 : index
    %0 = vector.load %arg1[%c0, %c0_0] : memref<40x32xf32, #tpu.memory_space<vmem>>, vector<40x32xf32>
    %1 = arith.truncf %0 : vector<40x32xf32> to vector<40x32xbf16>
    %c0_1 = arith.constant 0 : index
    %c0_2 = arith.constant 0 : index
    %2 = vector.load %arg2[%c0_1, %c0_2] : memref<32x64xbf16, #tpu.memory_space<vmem>>, vector<32x64xbf16>
    %cst = arith.constant dense<0.000000e+00> : vector<40x64xf32>
    %3 = tpu.matmul %1, %2, %cst {dimension_numbers = #tpu.dot_dimension_numbers<[1], [0], [0], [1], [0, 0, 1, 1], [], []>} : vector<40x32xbf16>, vector<32x64xbf16>, vector<40x64xf32> -> vector<40x64xf32>
    %c0_3 = arith.constant 0 : index
    %c0_4 = arith.constant 0 : index
    %4 = vector.load %arg3[%c0_3, %c0_4] : memref<1x64xf32, #tpu.memory_space<vmem>>, vector<1x64xf32>
    %5 = vector.broadcast %4 : vector<1x64xf32> to vector<40x64xf32>
    %6 = arith.addf %3, %5 : vector<40x64xf32>
    %cst_5 = arith.constant 0.000000e+00 : f32
    %7 = vector.broadcast %cst_5 : f32 to vector<40x64xf32>
    %8 = arith.maximumf %6, %7 : vector<40x64xf32>
    %9 = arith.truncf %8 : vector<40x64xf32> to vector<40x64xbf16>
    %c0_6 = arith.constant 0 : index
    %c0_7 = arith.constant 0 : index
    %10 = vector.load %arg4[%c0_6, %c0_7] : memref<64x64xbf16, #tpu.memory_space<vmem>>, vector<64x64xbf16>
    %cst_8 = arith.constant dense<0.000000e+00> : vector<40x64xf32>
    %11 = tpu.matmul %9, %10, %cst_8 {dimension_numbers = #tpu.dot_dimension_numbers<[1], [0], [0], [1], [0, 0, 1, 1], [], []>} : vector<40x64xbf16>, vector<64x64xbf16>, vector<40x64xf32> -> vector<40x64xf32>
    %c0_9 = arith.constant 0 : index
    %c0_10 = arith.constant 0 : index
    %12 = vector.load %arg5[%c0_9, %c0_10] : memref<1x64xf32, #tpu.memory_space<vmem>>, vector<1x64xf32>
    %13 = vector.broadcast %12 : vector<1x64xf32> to vector<40x64xf32>
    %14 = arith.addf %11, %13 : vector<40x64xf32>
    %cst_11 = arith.constant 0.000000e+00 : f32
    %15 = vector.broadcast %cst_11 : f32 to vector<40x64xf32>
    %16 = arith.maximumf %14, %15 : vector<40x64xf32>
    %17 = arith.truncf %16 : vector<40x64xf32> to vector<40x64xbf16>
    %c0_12 = arith.constant 0 : index
    %c0_13 = arith.constant 0 : index
    %18 = vector.load %arg6[%c0_12, %c0_13] : memref<64x8xbf16, #tpu.memory_space<vmem>>, vector<64x8xbf16>
    %cst_14 = arith.constant dense<0.000000e+00> : vector<40x8xf32>
    %19 = tpu.matmul %17, %18, %cst_14 {dimension_numbers = #tpu.dot_dimension_numbers<[1], [0], [0], [1], [0, 0, 1, 1], [], []>} : vector<40x64xbf16>, vector<64x8xbf16>, vector<40x8xf32> -> vector<40x8xf32>
    %c0_15 = arith.constant 0 : index
    %c0_16 = arith.constant 0 : index
    %20 = vector.load %arg7[%c0_15, %c0_16] : memref<1x8xf32, #tpu.memory_space<vmem>>, vector<1x8xf32>
    %21 = vector.broadcast %20 : vector<1x8xf32> to vector<40x8xf32>
    %22 = arith.addf %19, %21 : vector<40x8xf32>
    %23 = arith.negf %22 : vector<40x8xf32>
    %24 = math.exp %23 : vector<40x8xf32>
    %cst_17 = arith.constant 1.000000e+00 : f32
    %25 = vector.broadcast %cst_17 : f32 to vector<40x8xf32>
    %26 = arith.addf %25, %24 : vector<40x8xf32>
    %27 = arith.divf %25, %26 : vector<40x8xf32>
    %c0_18 = arith.constant 0 : index
    %c0_19 = arith.constant 0 : index
    %28 = vector.load %arg8[%c0_18, %c0_19] : memref<40x8xf32, #tpu.memory_space<vmem>>, vector<40x8xf32>
    tpu.vector_store %arg8[%c0_18, %c0_19], %27 {strides = array<i32>} : memref<40x8xf32, #tpu.memory_space<vmem>>, vector<40x8xf32>,
    return
  }
  func.func @transform_0(%arg0: i32) -> (i32, i32) {
    %c0_i32 = arith.constant 0 : i32
    %c0_i32_0 = arith.constant 0 : i32
    return %arg0, %c0_i32 : i32, i32
  }
  func.func @transform_1(%arg0: i32) -> (i32, i32) {
    %c0_i32 = arith.constant 0 : i32
    %c0_i32_0 = arith.constant 0 : i32
    %c0_i32_1 = arith.constant 0 : i32
    return %c0_i32, %c0_i32_0 : i32, i32
  }
  func.func @transform_2(%arg0: i32) -> (i32, i32) {
    %c0_i32 = arith.constant 0 : i32
    %c0_i32_0 = arith.constant 0 : i32
    %c0_i32_1 = arith.constant 0 : i32
    return %c0_i32, %c0_i32_0 : i32, i32
  }
  func.func @transform_3(%arg0: i32) -> (i32, i32) {
    %c0_i32 = arith.constant 0 : i32
    %c0_i32_0 = arith.constant 0 : i32
    %c0_i32_1 = arith.constant 0 : i32
    return %c0_i32, %c0_i32_0 : i32, i32
  }
  func.func @transform_4(%arg0: i32) -> (i32, i32) {
    %c0_i32 = arith.constant 0 : i32
    %c0_i32_0 = arith.constant 0 : i32
    %c0_i32_1 = arith.constant 0 : i32
    return %c0_i32, %c0_i32_0 : i32, i32
  }
  func.func @transform_5(%arg0: i32) -> (i32, i32) {
    %c0_i32 = arith.constant 0 : i32
    %c0_i32_0 = arith.constant 0 : i32
    %c0_i32_1 = arith.constant 0 : i32
    return %c0_i32, %c0_i32_0 : i32, i32
  }
  func.func @transform_6(%arg0: i32) -> (i32, i32) {
    %c0_i32 = arith.constant 0 : i32
    %c0_i32_0 = arith.constant 0 : i32
    %c0_i32_1 = arith.constant 0 : i32
    return %c0_i32, %c0_i32_0 : i32, i32
  }
  func.func @transform_7(%arg0: i32) -> (i32, i32) {
    %c0_i32 = arith.constant 0 : i32
    %c0_i32_0 = arith.constant 0 : i32
    return %arg0, %c0_i32 : i32, i32
  }
}

</mosaic_0001>

<bundles_post_ra>
// kernel: actor_ppo_forward.1
= control target key start
LH: loop header
LB: loop body
LE: loop exit
PB: predicated region body
PF: predicated region fallthrough
CT: control target
= control target key end

     0   :  { %vm55_vm0 = vcmask 261120   ;;  %vm132_vm1 = vcmask 523264   ;;  %vm336_vm5 = vcmask 64512   ;;  %s557_s1 = inlined_call_operand.vmem [shape: bf16[32,64], index: 1, kind: input, shape index: {}]   ;;  %s558_s0 = inlined_call_operand.vmem [shape: f32[37,32], index: 0, kind: input, shape index: {}]   ;;  %s559_s2 = inlined_call_operand.vmem [shape: f32[1,64], index: 2, kind: input, shape index: {}]   ;;  %s560_s4 = inlined_call_operand.vmem [shape: f32[1,64], index: 4, kind: input, shape index: {}]   ;;  %s561_s3 = inlined_call_operand.vmem [shape: bf16[64,64], index: 3, kind: input, shape index: {}]   ;;  %s562_s6 = inlined_call_operand.vmem [shape: f32[1,8], index: 6, kind: input, shape index: {}]   ;;  %s563_s5 = inlined_call_operand.vmem [shape: bf16[64,8], index: 5, kind: input, shape index: {}]   ;;  %s564_s7 = inlined_call_operand.vmem [shape: f32[37,8], index: 7, kind: output, shape index: {}]  }
   0x1   :  { %v401_v0 = vld [vmem:[%s557_s1 + $0x8] sm:$0xff]  ;;  %v400_v1 = vld [vmem:[%s557_s1] sm:$0xff]  ;;  %v29_v5 = vld [vmem:[%s558_s0 + $0x10] sm:$0xff] }
   0x2   :  { %71 = vmatpush.bf16.msra.mxu0 %v401_v0  ;;  %v27_v2 = vld [vmem:[%s558_s0] sm:$0xff]  ;;  %v28_v3 = vld [vmem:[%s558_s0 + $0x8] sm:$0xff]  ;;  %v30_v6 = vld [vmem:[%s558_s0 + $0x18] sm:$0xff] }
   0x3   :  { %v32_v4 = vpack.c.bf16 %v28_v3, %v27_v2  ;;  %v33_v7 = vpack.c.bf16 %v30_v6, %v29_v5  ;;  %v31_v8 = vld [vmem:[%s558_s0 + $0x20] sm:$0xff]  ;;  %v405_v10 = vld [vmem:[%s561_s3 + $0x18] sm:$0xff]  ;;  %v404_v11 = vld [vmem:[%s561_s3 + $0x10] sm:$0xff] }
   0x4   :  { %v34_v9 = vpack.c.bf16 %v31_v8, %v31_v8  ;;  %146 = vmatpush.bf16.msra.mxu1 %v405_v10  ;;  %410 = vmatpush.bf16.msra.mxu3 %v405_v10  ;;  %v403_v12 = vld [vmem:[%s561_s3 + $0x8] sm:$0xff]  ;;  %v402_v13 = vld [vmem:[%s561_s3] sm:$0xff]  ;;  %v409_v34 = vld [vmem:[%s563_s5 + $0x18] sm:$0xff] }
   0x5   :  { %v414_v15 = vld [vmem:[%s559_s2] ss:$0 sm:$0xff]  ;;  %222 = vmatpush.bf16.msra.mxu2 %v409_v34  ;;  %v408_v35 = vld [vmem:[%s563_s5 + $0x10] sm:$0xff]  ;;  %v407_v36 = vld [vmem:[%s563_s5 + $0x8] sm:$0xff] }
   0x6   :  { %72 = vmatpush.bf16.msra.mxu0 %v400_v1  ;;  %v406_v37 = vld [vmem:[%s563_s5] sm:$0xff] }
   0x7   :  { %v415_v39 = vld [vmem:[%s560_s4] ss:$0 sm:$0xff] }
   0x8   :  { %147 = vmatpush.bf16.msra.mxu1 %v404_v11  ;;  %411 = vmatpush.bf16.msra.mxu3 %v404_v11  ;;  %v416_v58 = vld [vmem:[%s562_s6] ss:$0 sm:$0xff] }
   0x9   :  { %354 = vmatmul.msk.bf16.vlgmr.msra.gmra.mxu0 %vm55_vm0, %v32_v4  ;;  %223 = vmatpush.bf16.msra.mxu2 %v408_v35 }
   0xc   :  { %148 = vmatpush.bf16.msra.mxu1 %v403_v12  ;;  %412 = vmatpush.bf16.msra.mxu3 %v403_v12 }
   0xd   :  { %224 = vmatpush.bf16.msra.mxu2 %v407_v36 }
  0x10   :  { %149 = vmatpush.bf16.msra.mxu1 %v402_v13  ;;  %413 = vmatpush.bf16.msra.mxu3 %v402_v13 }
  0x11   :  { %225 = vmatpush.bf16.msra.mxu2 %v406_v37 }
  0x19   :  { %355 = vmatmul.msk.bf16.gmra.mxu0 %vm55_vm0, %v33_v7 }
  0x29   :  { %356 = vmatmul.msk.bf16.gmra.mxu0 %vm55_vm0, %v34_v9 }
  0x86   :  { %v74_v14 = vpop.f32.mrf.mxu0 }
  0x87   :  { %v75_v16 = vadd.f32 %v414_v15, %v74_v14 }
  0x89   :  { %v88_v19 = vmax.f32 %v75_v16, 0.0 }
  0x8e   :  { %v76_v17 = vpop.f32.mrf.mxu0 }
  0x8f   :  { %v77_v18 = vadd.f32 %v414_v15, %v76_v17 }
  0x91   :  { %v89_v20 = vmax.f32 %v77_v18, 0.0 }
  0x93   :  { %v93_v21 = vpack.c.bf16 %v89_v20, %v88_v19 }
  0x95   :  { %373 = vmatmul.msk.bf16.vlgmr.msra.gmra.mxu1 %vm132_vm1, %v93_v21 }
  0x96   :  { %v79_v22 = vpop.f32.mrf.mxu0 }
  0x97   :  { %v80_v23 = vadd.f32 %v414_v15, %v79_v22 }
  0x99   :  { %v90_v26 = vmax.f32 %v80_v23, 0.0 }
  0x9e   :  { %v81_v24 = vpop.f32.mrf.mxu0 }
  0x9f   :  { %v82_v25 = vadd.f32 %v414_v15, %v81_v24 }
  0xa1   :  { %v91_v27 = vmax.f32 %v82_v25, 0.0 }
  0xa3   :  { %v94_v28 = vpack.c.bf16 %v91_v27, %v90_v26 }
  0xa5   :  { %374 = vmatmul.msk.bf16.vlgmr.msra.gmra.mxu3 %vm132_vm1, %v94_v28 }
  0xa6   :  { %v84_v29 = vpop.f32.mrf.mxu0 }
  0xa7   :  { %v85_v30 = vadd.f32 %v414_v15, %v84_v29 }
  0xa9   :  { %v92_v31 = vmax.f32 %v85_v30, 0.0 }
  0xab   :  { %v95_v33 = vpack.c.bf16 %v92_v31, %v92_v31 }
  0xae   :  { %v86_v32 = vpop.f32.mrf.mxu0 }
  0xb5   :  { %375 = vmatmul.msk.bf16.gmra.mxu3 %vm132_vm1, %v95_v33 }
 0x112   :  { %v151_v38 = vpop.f32.mrf.mxu1 }
 0x113   :  { %v152_v40 = vadd.f32 %v415_v39, %v151_v38 }
 0x115   :  { %v165_v43 = vmax.f32 %v152_v40, 0.0 }
 0x11a   :  { %v153_v41 = vpop.f32.mrf.mxu1 }
 0x11b   :  { %v154_v42 = vadd.f32 %v415_v39, %v153_v41 }
 0x11d   :  { %v166_v44 = vmax.f32 %v154_v42, 0.0 }
 0x11f   :  { %v170_v45 = vpack.c.bf16 %v166_v44, %v165_v43 }
 0x121   :  { %392 = vmatmul.msk.bf16.vlgmr.msra.gmra.mxu2 %vm132_vm1, %v170_v45 }
 0x128   :  { %v156_v46 = vpop.f32.mrf.mxu3 }
 0x129   :  { %v157_v47 = vadd.f32 %v415_v39, %v156_v46 }
 0x12b   :  { %v167_v50 = vmax.f32 %v157_v47, 0.0 }
 0x130   :  { %v158_v48 = vpop.f32.mrf.mxu3 }
 0x131   :  { %v159_v49 = vadd.f32 %v415_v39, %v158_v48 }
 0x133   :  { %v168_v51 = vmax.f32 %v159_v49, 0.0 }
 0x135   :  { %v171_v52 = vpack.c.bf16 %v168_v51, %v167_v50 }
 0x137   :  { %393 = vmatmul.msk.bf16.gmra.mxu2 %vm132_vm1, %v171_v52 }
 0x138   :  { %v161_v53 = vpop.f32.mrf.mxu3 }
 0x139   :  { %v162_v54 = vadd.f32 %v415_v39, %v161_v53 }
 0x13b   :  { %v169_v55 = vmax.f32 %v162_v54, 0.0 }
 0x13d   :  { %v172_v57 = vpack.c.bf16 %v169_v55, %v169_v55 }
 0x140   :  { %v163_v56 = vpop.f32.mrf.mxu3 }
 0x147   :  { %394 = vmatmul.msk.bf16.gmra.mxu2 %vm132_vm1, %v172_v57 }
 0x1a4   :  { %v227_v59 = vpop.f32.mrf.mxu2 }
 0x1a5   :  { %v228_v60 = vadd.f32 %v416_v58, %v227_v59 }
 0x1a7   :  { %v395_v61 = vmul.f32 -1.442695, %v228_v60 }
 0x1a9   :  { %417 = vpow2.f32 %v395_v61 }
 0x1ac   :  { %v229_v62 = vpop.f32.mrf.mxu2 }
 0x1ad   :  { %v230_v63 = vadd.f32 %v416_v58, %v229_v62 }
 0x1af   :  { %v418_v0 = vpop.eup %417  ;;  %v396_v1 = vmul.f32 -1.442695, %v230_v63 }
 0x1b0   :  { %v256_v2 = vadd.f32 1.0, %v418_v0 }
 0x1b1   :  { %419 = vpow2.f32 %v396_v1 }
 0x1b2   :  { %421 = vrcp.f32 %v256_v2  ;;  %v272_v10 = vand.u32 2147483648, %v256_v2  ;;  %v270_v12 = vand.u32 2147483647, %v256_v2  ;;  %vm266_vm3 = vweird.f32 %v256_v2 }
 0x1b4   :  { %v273_v16 = vor.u32 1.1754944e-38, %v272_v10  ;;  %vm271_vm6 = vcmp.eq.f32.partialorder %v270_v12, 8.507059e+37 }
 0x1b7   :  { %v420_v3 = vpop.eup %419 }
 0x1b8   :  { %v422_v4 = vpop.eup %421  ;;  %v257_v5 = vadd.f32 1.0, %v420_v3 }
 0x1b9   :  { %v262_v6 = vmul.f32 %v422_v4, %v256_v2  ;;  %vm267_vm2 = vweird.f32 %v422_v4 }
 0x1ba   :  { %423 = vrcp.f32 %v257_v5  ;;  %v232_v7 = vpop.f32.mrf.mxu2  ;;  %vm268_vm4 = vmor %vm266_vm3, %vm267_vm2  ;;  %v287_v23 = vand.u32 2147483648, %v257_v5  ;;  %v285_v26 = vand.u32 2147483647, %v257_v5  ;;  %vm281_vm8 = vweird.f32 %v257_v5 }
 0x1bb   :  { %v263_v8 = vsub.f32 1.0, %v262_v6  ;;  %v233_v9 = vadd.f32 %v416_v58, %v232_v7 }
 0x1bc   :  { %v288_v30 = vor.u32 1.1754944e-38, %v287_v23  ;;  %vm286_vm10 = vcmp.eq.f32.partialorder %v285_v26, 8.507059e+37 }
 0x1bd   :  { %v264_v11 = vmul.f32 %v422_v4, %v263_v8  ;;  %v397_v13 = vmul.f32 -1.442695, %v233_v9 }
 0x1bf   :  { %v265_v14 = vadd.f32 %v422_v4, %v264_v11  ;;  %425 = vpow2.f32 %v397_v13 }
 0x1c0   :  { %v424_v15 = vpop.eup %423 }
 0x1c1   :  { %v269_v17 = vsel %vm268_vm4, %v422_v4, %v265_v14  ;;  %v277_v18 = vmul.f32 %v424_v15, %v257_v5  ;;  %vm282_vm7 = vweird.f32 %v424_v15 }
 0x1c2   :  { %v274_v19 = vsel %vm271_vm6, %v273_v16, %v269_v17  ;;  %v234_v20 = vpop.f32.mrf.mxu2  ;;  %vm283_vm9 = vmor %vm281_vm8, %vm282_vm7 }
 0x1c3   :  { %337 = vst.msk [vmem:[%s564_s7] sm:$0xff] %vm336_vm5, %v274_v19  ;;  %v278_v21 = vsub.f32 1.0, %v277_v18  ;;  %v235_v22 = vadd.f32 %v416_v58, %v234_v20 }
 0x1c5   :  { %v426_v24 = vpop.eup %425  ;;  %v279_v25 = vmul.f32 %v424_v15, %v278_v21  ;;  %v398_v27 = vmul.f32 -1.442695, %v235_v22 }
 0x1c6   :  { %v258_v28 = vadd.f32 1.0, %v426_v24 }
 0x1c7   :  { %v280_v29 = vadd.f32 %v424_v15, %v279_v25  ;;  %427 = vpow2.f32 %v398_v27 }
 0x1c8   :  { %429 = vrcp.f32 %v258_v28  ;;  %v302_v41 = vand.u32 2147483648, %v258_v28  ;;  %v300_v44 = vand.u32 2147483647, %v258_v28  ;;  %vm296_vm12 = vweird.f32 %v258_v28 }
 0x1c9   :  { %v284_v31 = vsel %vm283_vm9, %v424_v15, %v280_v29 }
 0x1ca   :  { %v289_v32 = vsel %vm286_vm10, %v288_v30, %v284_v31  ;;  %v237_v33 = vpop.f32.mrf.mxu2  ;;  %v303_v48 = vor.u32 1.1754944e-38, %v302_v41  ;;  %vm301_vm14 = vcmp.eq.f32.partialorder %v300_v44, 8.507059e+37 }
 0x1cb   :  { %338 = vst.msk [vmem:[%s564_s7 + $0x8] sm:$0xff] %vm336_vm5, %v289_v32  ;;  %v238_v34 = vadd.f32 %v416_v58, %v237_v33 }
 0x1cd   :  { %v428_v35 = vpop.eup %427  ;;  %v399_v36 = vmul.f32 -1.442695, %v238_v34 }
 0x1ce   :  { %v430_v37 = vpop.eup %429  ;;  %v259_v38 = vadd.f32 1.0, %v428_v35 }
 0x1cf   :  { %v292_v39 = vmul.f32 %v430_v37, %v258_v28  ;;  %431 = vpow2.f32 %v399_v36  ;;  %vm297_vm11 = vweird.f32 %v430_v37 }
 0x1d0   :  { %433 = vrcp.f32 %v259_v38  ;;  %vm298_vm13 = vmor %vm296_vm12, %vm297_vm11  ;;  %v317_v54 = vand.u32 2147483648, %v259_v38  ;;  %v315_v56 = vand.u32 2147483647, %v259_v38  ;;  %vm311_vm0 = vweird.f32 %v259_v38 }
 0x1d1   :  { %v293_v40 = vsub.f32 1.0, %v292_v39 }
 0x1d2   :  { %v239_v42 = vpop.f32.mrf.mxu2  ;;  %v318_v59 = vor.u32 1.1754944e-38, %v317_v54  ;;  %vm316_vm2 = vcmp.eq.f32.partialorder %v315_v56, 8.507059e+37 }
 0x1d3   :  { %v294_v43 = vmul.f32 %v430_v37, %v293_v40 }
 0x1d5   :  { %v432_v45 = vpop.eup %431  ;;  %v295_v46 = vadd.f32 %v430_v37, %v294_v43 }
 0x1d6   :  { %v434_v47 = vpop.eup %433  ;;  %v260_v49 = vadd.f32 1.0, %v432_v45 }
 0x1d7   :  { %v299_v50 = vsel %vm298_vm13, %v430_v37, %v295_v46  ;;  %v307_v51 = vmul.f32 %v434_v47, %v259_v38  ;;  %vm312_vm15 = vweird.f32 %v434_v47 }
 0x1d8   :  { %v304_v52 = vsel %vm301_vm14, %v303_v48, %v299_v50  ;;  %435 = vrcp.f32 %v260_v49  ;;  %vm313_vm1 = vmor %vm311_vm0, %vm312_vm15  ;;  %v332_v0 = vand.u32 2147483648, %v260_v49  ;;  %v330_v2 = vand.u32 2147483647, %v260_v49 }
 0x1d9   :  { %339 = vst.msk [vmem:[%s564_s7 + $0x10] sm:$0xff] %vm336_vm5, %v304_v52  ;;  %v308_v53 = vsub.f32 1.0, %v307_v51  ;;  %vm326_vm4 = vweird.f32 %v260_v49 }
 0x1da   :  { %v333_v4 = vor.u32 1.1754944e-38, %v332_v0  ;;  %vm331_vm7 = vcmp.eq.f32.partialorder %v330_v2, 8.507059e+37 }
 0x1db   :  { %v309_v55 = vmul.f32 %v434_v47, %v308_v53 }
 0x1dd   :  { %v310_v57 = vadd.f32 %v434_v47, %v309_v55 }
 0x1de   :  { %v436_v58 = vpop.eup %435 }
 0x1df   :  { %v314_v60 = vsel %vm313_vm1, %v434_v47, %v310_v57  ;;  %v322_v61 = vmul.f32 %v436_v58, %v260_v49  ;;  %vm327_vm3 = vweird.f32 %v436_v58 }
 0x1e0   :  { %v319_v62 = vsel %vm316_vm2, %v318_v59, %v314_v60  ;;  %vm328_vm6 = vmor %vm326_vm4, %vm327_vm3 }
 0x1e1   :  { %340 = vst.msk [vmem:[%s564_s7 + $0x18] sm:$0xff] %vm336_vm5, %v319_v62  ;;  %v323_v63 = vsub.f32 1.0, %v322_v61 }
 0x1e3   :  { %v324_v1 = vmul.f32 %v436_v58, %v323_v63 }
 0x1e5   :  { %v325_v3 = vadd.f32 %v436_v58, %v324_v1 }
 0x1e7   :  { %v329_v5 = vsel %vm328_vm6, %v436_v58, %v325_v3 }
 0x1e8   :  { %v334_v6 = vsel %vm331_vm7, %v333_v4, %v329_v5 }
 0x1e9   :  { %341 = vst.msk [vmem:[%s564_s7 + $0x20] sm:$0xff] %vm336_vm5, %v334_v6 }

</bundles_post_ra>
